<compile_context>
chip_gen: v7x
topology: tpu7x:2x2x1
jax: 0.10.0
libtpu: 0.0.40
codegen_flags: <defaults>
</compile_context>

<pallas_src>
import math
import functools

import jax
import jax.numpy as jnp
from jax import lax
from jax.experimental import pallas as pl
from jax.experimental.pallas import tpu as pltpu


# ---------------------------------------------------------------------------
# Packed-parameter slab layout, shape (8 + H, 4H) float32, gate order [i,f,g,o]:
#   row 0            : W_ih^T row                    (input_size == 1)
#   row 1            : b_ih + b_hh                   (i/f/o cols pre-scaled by 0.5)
#   row 2            : b_lin  (cols 0:out)
#   rows 3 .. 3+out  : W_lin  (out, H), padded to 4H cols
#   rows 8 .. 8+H    : W_hh^T (H, 4H)                (i/f/o cols pre-scaled by 0.5)
# The header fits inside the first (8,128) sublane tile; W_hh starts tile-aligned.
# ---------------------------------------------------------------------------
_HDR = 8


def _lstm_kernel(x_ref, slab_ref, out_ref, *, hidden, seq_len, output_size):
    H = hidden

    # ---- One whole-slab load; all weight slices hoisted out of the recurrence.
    slab = slab_ref[...]
    w_ih_row = slab[0:1, :]                       # (1, 4H)
    bias     = slab[1:2, :]                       # (1, 4H)  (i/f/o pre-scaled 0.5)
    b_lin    = slab[2:3, 0:output_size]           # (1, out)
    w_lin    = slab[3:3 + output_size, 0:H]       # (out, H)
    w_hh     = slab[_HDR:_HDR + H, :]             # (H, 4H), tile-aligned slice

    # ---- Hoisted input projection: K == input_size == 1 -> pure VPU broadcast
    # multiply (no MXU), bias folded in once.
    xwb = x_ref[...] * w_ih_row + bias            # (seq, 4H)

    h = jnp.zeros((1, H), jnp.float32)
    c = jnp.zeros((1, H), jnp.float32)

    # ---- Fully unrolled recurrence (seq_len static & tiny).
    # One MXU matmul per step (h @ W_hh) is all that remains on the serial chain;
    # its RHS is a hoisted value, so no per-step VMEM reloads.
    for t in range(seq_len):
        gates = xwb[t:t + 1, :] + jnp.dot(
            h, w_hh, preferred_element_type=jnp.float32)         # (1, 4H)

        # Single EUP pass: i/f/o columns were pre-scaled by 0.5, so tanh(gates)
        # holds tanh(z/2) on i/f/o lanes and tanh(z) on g lanes;
        # sigmoid(z) = 0.5 * tanh(z/2) + 0.5 is one VPU FMA.
        tah = jnp.tanh(gates)                                     # (1, 4H)
        sig = 0.5 * tah + 0.5                                     # (1, 4H)

        i_g = sig[:, 0:H]
        f_g = sig[:, H:2 * H]
        g_g = tah[:, 2 * H:3 * H]
        o_g = sig[:, 3 * H:4 * H]

        c = f_g * c + i_g * g_g
        h = o_g * jnp.tanh(c)

    # ---- Final Linear (tiny N) off the MXU: VPU multiply + lane reduce.
    prod = h * w_lin                                              # (out, H)
    lin = jnp.sum(prod, axis=-1, keepdims=True)                   # (out, 1)
    out_ref[...] = lin.reshape(1, -1) + b_lin                     # (1, out)


def lstm_forward(input_seq, packed_slab, *, hidden, output_size):
    """input_seq: (seq,) float32. Returns (output_size,) == PyTorch predictions[-1]."""
    seq_len = input_seq.shape[0]
    # Module spec: nn.LSTM(input_size=1, ...) consuming a 1-D series -> input_size == 1.
    x = input_seq.reshape(seq_len, 1).astype(jnp.float32)

    vmem = pl.BlockSpec(memory_space=pltpu.MemorySpace.VMEM)
    kernel = functools.partial(
        _lstm_kernel, hidden=hidden, seq_len=seq_len, output_size=output_size)

    # Single-sequence inference: total resident footprint is a few KiB, so whole-array
    # VMEM blocks with no grid are correct on all generations (incl. v7x's 64 MiB VMEM).
    # TODO(synk): if callers ever batch independent sequences, add a leading batch grid
    # axis with dimension_semantics=("parallel",) to occupy v7x's second TensorCore.
    out = pl.pallas_call(
        kernel,
        out_shape=jax.ShapeDtypeStruct((1, output_size), jnp.float32),
        in_specs=[vmem, vmem],
        out_specs=vmem,
    )(x, packed_slab)
    return out[0]


def init_params(key, input_size, hidden, output_size):
    """Deterministic init matching PyTorch param shapes (uniform(-1/sqrt(H), 1/sqrt(H))).

    Returns the RAW (unscaled) parameters; use pack_params() to build the kernel slab."""
    k = 1.0 / math.sqrt(hidden)
    ks = jax.random.split(key, 6)
    w_ih = jax.random.uniform(ks[0], (4 * hidden, input_size), jnp.float32, -k, k)
    w_hh = jax.random.uniform(ks[1], (4 * hidden, hidden), jnp.float32, -k, k)
    b_ih = jax.random.uniform(ks[2], (4 * hidden,), jnp.float32, -k, k)
    b_hh = jax.random.uniform(ks[3], (4 * hidden,), jnp.float32, -k, k)
    w_lin = jax.random.uniform(ks[4], (output_size, hidden), jnp.float32, -k, k)
    b_lin = jax.random.uniform(ks[5], (output_size,), jnp.float32, -k, k)
    return {
        "w_ih_t": w_ih.T,                           # (input_size, 4H)
        "w_hh_t": w_hh.T,                           # (H, 4H)
        "bias": (b_ih + b_hh).reshape(1, 4 * hidden),
        "w_lin": w_lin,                             # (out, H)  -- PyTorch Linear layout
        "b_lin": b_lin.reshape(1, output_size),
    }


def pack_params(params, *, hidden, input_size, output_size):
    """Pack all weights into the single (8 + H, 4H) f32 slab consumed by the kernel.

    i/f/o gate columns of W_ih^T, W_hh^T and bias are pre-scaled by 0.5 once here
    (sigmoid-via-tanh fold); the g columns stay raw.  Done once at init -> not per-call work."""
    H = hidden
    assert input_size == 1, "packed kernel specialises the module's input_size=1"
    assert 3 + output_size <= _HDR, "header layout supports output_size <= 5"

    scale = jnp.concatenate([
        jnp.full((2 * H,), 0.5, jnp.float32),        # i, f
        jnp.ones((H,), jnp.float32),                 # g
        jnp.full((H,), 0.5, jnp.float32),            # o
    ]).reshape(1, 4 * H)

    slab = jnp.zeros((_HDR + H, 4 * H), jnp.float32)
    slab = slab.at[0:1, :].set(params["w_ih_t"] * scale)
    slab = slab.at[1:2, :].set(params["bias"] * scale)
    slab = slab.at[2:3, 0:output_size].set(params["b_lin"])
    slab = slab.at[3:3 + output_size, 0:H].set(params["w_lin"])
    slab = slab.at[_HDR:_HDR + H, :].set(params["w_hh_t"] * scale)
    return slab


def lstm_forward_ref(input_seq, params, *, hidden, output_size):
    """Pure-JAX reference mirroring torch.nn.LSTM + Linear semantics (raw params)."""
    H = hidden
    seq_len = input_seq.shape[0]
    input_size = params["w_ih_t"].shape[0]
    x = input_seq.reshape(seq_len, input_size).astype(jnp.float32)

    def step(carry, x_t):
        h, c = carry
        gates = x_t[None, :] @ params["w_ih_t"] + h @ params["w_hh_t"] + params["bias"]
        i = jax.nn.sigmoid(gates[:, 0:H])
        f = jax.nn.sigmoid(gates[:, H:2 * H])
        g = jnp.tanh(gates[:, 2 * H:3 * H])
        o = jax.nn.sigmoid(gates[:, 3 * H:4 * H])
        c = f * c + i * g
        h = o * jnp.tanh(c)
        return (h, c), h

    (h, _), _ = lax.scan(step, (jnp.zeros((1, H)), jnp.zeros((1, H))), x)
    return (h @ params["w_lin"].T + params["b_lin"])[0]


if __name__ == "__main__":
    SEQ = 8
    INPUT_SIZE = 1
    HIDDEN = 32
    OUTPUT_SIZE = 1

    key = jax.random.PRNGKey(0)
    k_data, k_params = jax.random.split(key)
    input_seq = jax.random.normal(k_data, (SEQ,), jnp.float32)
    params = init_params(k_params, INPUT_SIZE, HIDDEN, OUTPUT_SIZE)
    packed = pack_params(params, hidden=HIDDEN, input_size=INPUT_SIZE,
                         output_size=OUTPUT_SIZE)

    out = lstm_forward(input_seq, packed, hidden=HIDDEN, output_size=OUTPUT_SIZE)
    out = jax.block_until_ready(out)

    ref = lstm_forward_ref(input_seq, params, hidden=HIDDEN, output_size=OUTPUT_SIZE)
    assert out.shape == (OUTPUT_SIZE,)
    # Kernel computes sigmoid via 0.5*tanh(z/2)+0.5 (mathematically identical, slightly
    # different rounding than the reference's exact sigmoid) -> 1e-4 tolerance per review.
    assert jnp.allclose(out, ref, atol=1e-4, rtol=1e-4), (out, ref)

    print("KERNEL_OK")
</pallas_src>

<mosaic_0001>
module attributes {stable_mosaic.version = 11 : i64} {
  func.func @_lstm_kernel(%arg0: memref<8x1xf32, #tpu.memory_space<vmem>>, %arg1: memref<40x128xf32, #tpu.memory_space<vmem>>, %arg2: memref<1x1xf32, #tpu.memory_space<vmem>>) attributes {dimension_semantics = [], scalar_prefetch = 0 : i64, scratch_operands = 0 : i64, tpu.core_type = #tpu.core_type<tc>} {
    %c0 = arith.constant 0 : index
    %c0_0 = arith.constant 0 : index
    %0 = vector.load %arg1[%c0, %c0_0] : memref<40x128xf32, #tpu.memory_space<vmem>>, vector<40x128xf32>
    %1 = vector.extract_strided_slice %0 {offsets = [0, 0], sizes = [1, 128], strides = [1, 1]} : vector<40x128xf32> to vector<1x128xf32>
    %2 = vector.extract_strided_slice %0 {offsets = [1, 0], sizes = [1, 128], strides = [1, 1]} : vector<40x128xf32> to vector<1x128xf32>
    %3 = vector.extract_strided_slice %0 {offsets = [2, 0], sizes = [1, 1], strides = [1, 1]} : vector<40x128xf32> to vector<1x1xf32>
    %4 = vector.extract_strided_slice %0 {offsets = [3, 0], sizes = [1, 32], strides = [1, 1]} : vector<40x128xf32> to vector<1x32xf32>
    %5 = vector.extract_strided_slice %0 {offsets = [8, 0], sizes = [32, 128], strides = [1, 1]} : vector<40x128xf32> to vector<32x128xf32>
    %c0_1 = arith.constant 0 : index
    %c0_2 = arith.constant 0 : index
    %6 = vector.load %arg0[%c0_1, %c0_2] : memref<8x1xf32, #tpu.memory_space<vmem>>, vector<8x1xf32>
    %7 = vector.broadcast %6 : vector<8x1xf32> to vector<8x128xf32>
    %8 = vector.broadcast %1 : vector<1x128xf32> to vector<8x128xf32>
    %9 = arith.mulf %7, %8 : vector<8x128xf32>
    %10 = vector.broadcast %2 : vector<1x128xf32> to vector<8x128xf32>
    %11 = arith.addf %9, %10 : vector<8x128xf32>
    %cst = arith.constant 0.000000e+00 : f32
    %12 = vector.broadcast %cst : f32 to vector<1x32xf32>
    %cst_3 = arith.constant 0.000000e+00 : f32
    %13 = vector.broadcast %cst_3 : f32 to vector<1x32xf32>
    %14 = vector.extract_strided_slice %11 {offsets = [0, 0], sizes = [1, 128], strides = [1, 1]} : vector<8x128xf32> to vector<1x128xf32>
    %cst_4 = arith.constant dense<0.000000e+00> : vector<1x128xf32>
    %15 = tpu.matmul %12, %5, %cst_4 {dimension_numbers = #tpu.dot_dimension_numbers<[1], [0], [0], [1], [0, 0, 1, 1], [], []>} : vector<1x32xf32>, vector<32x128xf32>, vector<1x128xf32> -> vector<1x128xf32>
    %16 = arith.addf %14, %15 : vector<1x128xf32>
    %17 = math.tanh %16 : vector<1x128xf32>
    %cst_5 = arith.constant 5.000000e-01 : f32
    %18 = vector.broadcast %cst_5 : f32 to vector<1x128xf32>
    %19 = arith.mulf %18, %17 : vector<1x128xf32>
    %cst_6 = arith.constant 5.000000e-01 : f32
    %20 = vector.broadcast %cst_6 : f32 to vector<1x128xf32>
    %21 = arith.addf %19, %20 : vector<1x128xf32>
    %22 = vector.extract_strided_slice %21 {offsets = [0, 0], sizes = [1, 32], strides = [1, 1]} : vector<1x128xf32> to vector<1x32xf32>
    %23 = vector.extract_strided_slice %21 {offsets = [0, 32], sizes = [1, 32], strides = [1, 1]} : vector<1x128xf32> to vector<1x32xf32>
    %24 = vector.extract_strided_slice %17 {offsets = [0, 64], sizes = [1, 32], strides = [1, 1]} : vector<1x128xf32> to vector<1x32xf32>
    %25 = vector.extract_strided_slice %21 {offsets = [0, 96], sizes = [1, 32], strides = [1, 1]} : vector<1x128xf32> to vector<1x32xf32>
    %26 = arith.mulf %23, %13 : vector<1x32xf32>
    %27 = arith.mulf %22, %24 : vector<1x32xf32>
    %28 = arith.addf %26, %27 : vector<1x32xf32>
    %29 = math.tanh %28 : vector<1x32xf32>
    %30 = arith.mulf %25, %29 : vector<1x32xf32>
    %31 = vector.extract_strided_slice %11 {offsets = [1, 0], sizes = [1, 128], strides = [1, 1]} : vector<8x128xf32> to vector<1x128xf32>
    %cst_7 = arith.constant dense<0.000000e+00> : vector<1x128xf32>
    %32 = tpu.matmul %30, %5, %cst_7 {dimension_numbers = #tpu.dot_dimension_numbers<[1], [0], [0], [1], [0, 0, 1, 1], [], []>} : vector<1x32xf32>, vector<32x128xf32>, vector<1x128xf32> -> vector<1x128xf32>
    %33 = arith.addf %31, %32 : vector<1x128xf32>
    %34 = math.tanh %33 : vector<1x128xf32>
    %cst_8 = arith.constant 5.000000e-01 : f32
    %35 = vector.broadcast %cst_8 : f32 to vector<1x128xf32>
    %36 = arith.mulf %35, %34 : vector<1x128xf32>
    %cst_9 = arith.constant 5.000000e-01 : f32
    %37 = vector.broadcast %cst_9 : f32 to vector<1x128xf32>
    %38 = arith.addf %36, %37 : vector<1x128xf32>
    %39 = vector.extract_strided_slice %38 {offsets = [0, 0], sizes = [1, 32], strides = [1, 1]} : vector<1x128xf32> to vector<1x32xf32>
    %40 = vector.extract_strided_slice %38 {offsets = [0, 32], sizes = [1, 32], strides = [1, 1]} : vector<1x128xf32> to vector<1x32xf32>
    %41 = vector.extract_strided_slice %34 {offsets = [0, 64], sizes = [1, 32], strides = [1, 1]} : vector<1x128xf32> to vector<1x32xf32>
    %42 = vector.extract_strided_slice %38 {offsets = [0, 96], sizes = [1, 32], strides = [1, 1]} : vector<1x128xf32> to vector<1x32xf32>
    %43 = arith.mulf %40, %28 : vector<1x32xf32>
    %44 = arith.mulf %39, %41 : vector<1x32xf32>
    %45 = arith.addf %43, %44 : vector<1x32xf32>
    %46 = math.tanh %45 : vector<1x32xf32>
    %47 = arith.mulf %42, %46 : vector<1x32xf32>
    %48 = vector.extract_strided_slice %11 {offsets = [2, 0], sizes = [1, 128], strides = [1, 1]} : vector<8x128xf32> to vector<1x128xf32>
    %cst_10 = arith.constant dense<0.000000e+00> : vector<1x128xf32>
    %49 = tpu.matmul %47, %5, %cst_10 {dimension_numbers = #tpu.dot_dimension_numbers<[1], [0], [0], [1], [0, 0, 1, 1], [], []>} : vector<1x32xf32>, vector<32x128xf32>, vector<1x128xf32> -> vector<1x128xf32>
    %50 = arith.addf %48, %49 : vector<1x128xf32>
    %51 = math.tanh %50 : vector<1x128xf32>
    %cst_11 = arith.constant 5.000000e-01 : f32
    %52 = vector.broadcast %cst_11 : f32 to vector<1x128xf32>
    %53 = arith.mulf %52, %51 : vector<1x128xf32>
    %cst_12 = arith.constant 5.000000e-01 : f32
    %54 = vector.broadcast %cst_12 : f32 to vector<1x128xf32>
    %55 = arith.addf %53, %54 : vector<1x128xf32>
    %56 = vector.extract_strided_slice %55 {offsets = [0, 0], sizes = [1, 32], strides = [1, 1]} : vector<1x128xf32> to vector<1x32xf32>
    %57 = vector.extract_strided_slice %55 {offsets = [0, 32], sizes = [1, 32], strides = [1, 1]} : vector<1x128xf32> to vector<1x32xf32>
    %58 = vector.extract_strided_slice %51 {offsets = [0, 64], sizes = [1, 32], strides = [1, 1]} : vector<1x128xf32> to vector<1x32xf32>
    %59 = vector.extract_strided_slice %55 {offsets = [0, 96], sizes = [1, 32], strides = [1, 1]} : vector<1x128xf32> to vector<1x32xf32>
    %60 = arith.mulf %57, %45 : vector<1x32xf32>
    %61 = arith.mulf %56, %58 : vector<1x32xf32>
    %62 = arith.addf %60, %61 : vector<1x32xf32>
    %63 = math.tanh %62 : vector<1x32xf32>
    %64 = arith.mulf %59, %63 : vector<1x32xf32>
    %65 = vector.extract_strided_slice %11 {offsets = [3, 0], sizes = [1, 128], strides = [1, 1]} : vector<8x128xf32> to vector<1x128xf32>
    %cst_13 = arith.constant dense<0.000000e+00> : vector<1x128xf32>
    %66 = tpu.matmul %64, %5, %cst_13 {dimension_numbers = #tpu.dot_dimension_numbers<[1], [0], [0], [1], [0, 0, 1, 1], [], []>} : vector<1x32xf32>, vector<32x128xf32>, vector<1x128xf32> -> vector<1x128xf32>
    %67 = arith.addf %65, %66 : vector<1x128xf32>
    %68 = math.tanh %67 : vector<1x128xf32>
    %cst_14 = arith.constant 5.000000e-01 : f32
    %69 = vector.broadcast %cst_14 : f32 to vector<1x128xf32>
    %70 = arith.mulf %69, %68 : vector<1x128xf32>
    %cst_15 = arith.constant 5.000000e-01 : f32
    %71 = vector.broadcast %cst_15 : f32 to vector<1x128xf32>
    %72 = arith.addf %70, %71 : vector<1x128xf32>
    %73 = vector.extract_strided_slice %72 {offsets = [0, 0], sizes = [1, 32], strides = [1, 1]} : vector<1x128xf32> to vector<1x32xf32>
    %74 = vector.extract_strided_slice %72 {offsets = [0, 32], sizes = [1, 32], strides = [1, 1]} : vector<1x128xf32> to vector<1x32xf32>
    %75 = vector.extract_strided_slice %68 {offsets = [0, 64], sizes = [1, 32], strides = [1, 1]} : vector<1x128xf32> to vector<1x32xf32>
    %76 = vector.extract_strided_slice %72 {offsets = [0, 96], sizes = [1, 32], strides = [1, 1]} : vector<1x128xf32> to vector<1x32xf32>
    %77 = arith.mulf %74, %62 : vector<1x32xf32>
    %78 = arith.mulf %73, %75 : vector<1x32xf32>
    %79 = arith.addf %77, %78 : vector<1x32xf32>
    %80 = math.tanh %79 : vector<1x32xf32>
    %81 = arith.mulf %76, %80 : vector<1x32xf32>
    %82 = vector.extract_strided_slice %11 {offsets = [4, 0], sizes = [1, 128], strides = [1, 1]} : vector<8x128xf32> to vector<1x128xf32>
    %cst_16 = arith.constant dense<0.000000e+00> : vector<1x128xf32>
    %83 = tpu.matmul %81, %5, %cst_16 {dimension_numbers = #tpu.dot_dimension_numbers<[1], [0], [0], [1], [0, 0, 1, 1], [], []>} : vector<1x32xf32>, vector<32x128xf32>, vector<1x128xf32> -> vector<1x128xf32>
    %84 = arith.addf %82, %83 : vector<1x128xf32>
    %85 = math.tanh %84 : vector<1x128xf32>
    %cst_17 = arith.constant 5.000000e-01 : f32
    %86 = vector.broadcast %cst_17 : f32 to vector<1x128xf32>
    %87 = arith.mulf %86, %85 : vector<1x128xf32>
    %cst_18 = arith.constant 5.000000e-01 : f32
    %88 = vector.broadcast %cst_18 : f32 to vector<1x128xf32>
    %89 = arith.addf %87, %88 : vector<1x128xf32>
    %90 = vector.extract_strided_slice %89 {offsets = [0, 0], sizes = [1, 32], strides = [1, 1]} : vector<1x128xf32> to vector<1x32xf32>
    %91 = vector.extract_strided_slice %89 {offsets = [0, 32], sizes = [1, 32], strides = [1, 1]} : vector<1x128xf32> to vector<1x32xf32>
    %92 = vector.extract_strided_slice %85 {offsets = [0, 64], sizes = [1, 32], strides = [1, 1]} : vector<1x128xf32> to vector<1x32xf32>
    %93 = vector.extract_strided_slice %89 {offsets = [0, 96], sizes = [1, 32], strides = [1, 1]} : vector<1x128xf32> to vector<1x32xf32>
    %94 = arith.mulf %91, %79 : vector<1x32xf32>
    %95 = arith.mulf %90, %92 : vector<1x32xf32>
    %96 = arith.addf %94, %95 : vector<1x32xf32>
    %97 = math.tanh %96 : vector<1x32xf32>
    %98 = arith.mulf %93, %97 : vector<1x32xf32>
    %99 = vector.extract_strided_slice %11 {offsets = [5, 0], sizes = [1, 128], strides = [1, 1]} : vector<8x128xf32> to vector<1x128xf32>
    %cst_19 = arith.constant dense<0.000000e+00> : vector<1x128xf32>
    %100 = tpu.matmul %98, %5, %cst_19 {dimension_numbers = #tpu.dot_dimension_numbers<[1], [0], [0], [1], [0, 0, 1, 1], [], []>} : vector<1x32xf32>, vector<32x128xf32>, vector<1x128xf32> -> vector<1x128xf32>
    %101 = arith.addf %99, %100 : vector<1x128xf32>
    %102 = math.tanh %101 : vector<1x128xf32>
    %cst_20 = arith.constant 5.000000e-01 : f32
    %103 = vector.broadcast %cst_20 : f32 to vector<1x128xf32>
    %104 = arith.mulf %103, %102 : vector<1x128xf32>
    %cst_21 = arith.constant 5.000000e-01 : f32
    %105 = vector.broadcast %cst_21 : f32 to vector<1x128xf32>
    %106 = arith.addf %104, %105 : vector<1x128xf32>
    %107 = vector.extract_strided_slice %106 {offsets = [0, 0], sizes = [1, 32], strides = [1, 1]} : vector<1x128xf32> to vector<1x32xf32>
    %108 = vector.extract_strided_slice %106 {offsets = [0, 32], sizes = [1, 32], strides = [1, 1]} : vector<1x128xf32> to vector<1x32xf32>
    %109 = vector.extract_strided_slice %102 {offsets = [0, 64], sizes = [1, 32], strides = [1, 1]} : vector<1x128xf32> to vector<1x32xf32>
    %110 = vector.extract_strided_slice %106 {offsets = [0, 96], sizes = [1, 32], strides = [1, 1]} : vector<1x128xf32> to vector<1x32xf32>
    %111 = arith.mulf %108, %96 : vector<1x32xf32>
    %112 = arith.mulf %107, %109 : vector<1x32xf32>
    %113 = arith.addf %111, %112 : vector<1x32xf32>
    %114 = math.tanh %113 : vector<1x32xf32>
    %115 = arith.mulf %110, %114 : vector<1x32xf32>
    %116 = vector.extract_strided_slice %11 {offsets = [6, 0], sizes = [1, 128], strides = [1, 1]} : vector<8x128xf32> to vector<1x128xf32>
    %cst_22 = arith.constant dense<0.000000e+00> : vector<1x128xf32>
    %117 = tpu.matmul %115, %5, %cst_22 {dimension_numbers = #tpu.dot_dimension_numbers<[1], [0], [0], [1], [0, 0, 1, 1], [], []>} : vector<1x32xf32>, vector<32x128xf32>, vector<1x128xf32> -> vector<1x128xf32>
    %118 = arith.addf %116, %117 : vector<1x128xf32>
    %119 = math.tanh %118 : vector<1x128xf32>
    %cst_23 = arith.constant 5.000000e-01 : f32
    %120 = vector.broadcast %cst_23 : f32 to vector<1x128xf32>
    %121 = arith.mulf %120, %119 : vector<1x128xf32>
    %cst_24 = arith.constant 5.000000e-01 : f32
    %122 = vector.broadcast %cst_24 : f32 to vector<1x128xf32>
    %123 = arith.addf %121, %122 : vector<1x128xf32>
    %124 = vector.extract_strided_slice %123 {offsets = [0, 0], sizes = [1, 32], strides = [1, 1]} : vector<1x128xf32> to vector<1x32xf32>
    %125 = vector.extract_strided_slice %123 {offsets = [0, 32], sizes = [1, 32], strides = [1, 1]} : vector<1x128xf32> to vector<1x32xf32>
    %126 = vector.extract_strided_slice %119 {offsets = [0, 64], sizes = [1, 32], strides = [1, 1]} : vector<1x128xf32> to vector<1x32xf32>
    %127 = vector.extract_strided_slice %123 {offsets = [0, 96], sizes = [1, 32], strides = [1, 1]} : vector<1x128xf32> to vector<1x32xf32>
    %128 = arith.mulf %125, %113 : vector<1x32xf32>
    %129 = arith.mulf %124, %126 : vector<1x32xf32>
    %130 = arith.addf %128, %129 : vector<1x32xf32>
    %131 = math.tanh %130 : vector<1x32xf32>
    %132 = arith.mulf %127, %131 : vector<1x32xf32>
    %133 = vector.extract_strided_slice %11 {offsets = [7, 0], sizes = [1, 128], strides = [1, 1]} : vector<8x128xf32> to vector<1x128xf32>
    %cst_25 = arith.constant dense<0.000000e+00> : vector<1x128xf32>
    %134 = tpu.matmul %132, %5, %cst_25 {dimension_numbers = #tpu.dot_dimension_numbers<[1], [0], [0], [1], [0, 0, 1, 1], [], []>} : vector<1x32xf32>, vector<32x128xf32>, vector<1x128xf32> -> vector<1x128xf32>
    %135 = arith.addf %133, %134 : vector<1x128xf32>
    %136 = math.tanh %135 : vector<1x128xf32>
    %cst_26 = arith.constant 5.000000e-01 : f32
    %137 = vector.broadcast %cst_26 : f32 to vector<1x128xf32>
    %138 = arith.mulf %137, %136 : vector<1x128xf32>
    %cst_27 = arith.constant 5.000000e-01 : f32
    %139 = vector.broadcast %cst_27 : f32 to vector<1x128xf32>
    %140 = arith.addf %138, %139 : vector<1x128xf32>
    %141 = vector.extract_strided_slice %140 {offsets = [0, 0], sizes = [1, 32], strides = [1, 1]} : vector<1x128xf32> to vector<1x32xf32>
    %142 = vector.extract_strided_slice %140 {offsets = [0, 32], sizes = [1, 32], strides = [1, 1]} : vector<1x128xf32> to vector<1x32xf32>
    %143 = vector.extract_strided_slice %136 {offsets = [0, 64], sizes = [1, 32], strides = [1, 1]} : vector<1x128xf32> to vector<1x32xf32>
    %144 = vector.extract_strided_slice %140 {offsets = [0, 96], sizes = [1, 32], strides = [1, 1]} : vector<1x128xf32> to vector<1x32xf32>
    %145 = arith.mulf %142, %130 : vector<1x32xf32>
    %146 = arith.mulf %141, %143 : vector<1x32xf32>
    %147 = arith.addf %145, %146 : vector<1x32xf32>
    %148 = math.tanh %147 : vector<1x32xf32>
    %149 = arith.mulf %144, %148 : vector<1x32xf32>
    %150 = arith.mulf %149, %4 : vector<1x32xf32>
    %cst_28 = arith.constant dense<0.000000e+00> : vector<1xf32>
    %151 = vector.multi_reduction <add>, %150, %cst_28 [1] : vector<1x32xf32> to vector<1xf32>
    %152 = vector.shape_cast %151 : vector<1xf32> to vector<1x1xf32>
    %153 = arith.addf %152, %3 : vector<1x1xf32>
    %c0_29 = arith.constant 0 : index
    %c0_30 = arith.constant 0 : index
    %154 = vector.load %arg2[%c0_29, %c0_30] : memref<1x1xf32, #tpu.memory_space<vmem>>, vector<1x1xf32>
    tpu.vector_store %arg2[%c0_29, %c0_30], %153 {strides = array<i32>} : memref<1x1xf32, #tpu.memory_space<vmem>>, vector<1x1xf32>,
    return
  }
}

</mosaic_0001>

<bundles_post_ra>
// kernel: tpu_custom_call.1
= control target key start
LH: loop header
LB: loop body
LE: loop exit
PB: predicated region body
PF: predicated region fallthrough
CT: control target
= control target key end

     0   :  { %7 = vsyncpa [#allocation3], 0  ;;  %s1332_s0 = inlined_call_operand.vmem [shape: f32[8,1], index: 0, kind: input, shape index: {}]   ;;  %s1333_s1 = inlined_call_operand.hbm [shape: f32[40,128], index: 1, kind: input, shape index: {}]   ;;  %s1334_s2 = inlined_call_operand.hbm [shape: f32[1,1], index: 2, kind: output, shape index: {}]  }
   0x1   :  { %8 = vsyncpa [#allocation4], 0  ;;  %s1171_s9 = smov [#allocation2]   ;;  %s1123_s13 = scalar_lea.hbm %s1333_s1, 640 }
   0x2   :  { %s16_s10 = sshll.u32 %s1171_s9, 4  ;;  %p1124_p0 = scmp.ne.s32.totalorder %s1333_s1, %s1123_s13  ;;  %s17_s10 = int_to_ptr.vmem [resolvable:$true] %s16_s10 }
   0x3   :  { %p1127_p1 = scmp.lt.u32.totalorder %s1123_s13, %s1333_s1 }
   0x5   :  { %p1129_p2 = pnand %p1127_p1, %p1124_p0 }
   0x7   :  { %1132 = shalt.err (!%p1129_p2)
}
   0x8   :  { %s1133_s18 = scalar_lea.vmem %s17_s10, 640  ;;  %p1138_p4 = scmp.lt.s32.totalorder %s17_s10, %s17_s10 }
   0x9   :  { %p1134_p3 = scmp.ne.s32.totalorder %s17_s10, %s1133_s18  ;;  %p1139_p5 = scmp.lt.s32.totalorder %s1133_s18, %s1133_s18 }
   0xb   :  { %p1140_p6 = por %p1139_p5, %p1138_p4 }
   0xd   :  { %p1141_p7 = pnand %p1140_p6, %p1134_p3 }
   0xf   :  { %1144 = shalt.err (!%p1141_p7)
}
  0x10   :  { %s1172_s19 = smov 128   ;;  %s1173_s20 = smov 8  }
  0x11   :  { %22 = dma.hbm_to_vmem [thread:$0]  %s1333_s1, 640, %s17_s10, [#allocation3], %s1172_s19, %s1172_s19, %s1173_s20  }
  0x12   :  { %1167 = dma.done.wait [#allocation3], 640  }
  0x13   :  { %1168 = vsyncadd [#allocation3], 4294966656  ;;  %v1174_v0 = vmov 0.0|0.0   ;;  %vm1175_vm0 = vmmov 0   ;;  %v1176_v1 = vmov 0.0   ;;  %v1177_v2 = vmov 0  }
  0x14   :  { %1031 = vmatprep.subr.bf16.mxu0 %v1174_v0  ;;  %951 = vmatprep.mubr.msk.f32.mxu0 %vm1175_vm0, %v1176_v1  ;;  %v27_v3 = vld [vmem:[#allocation2 + $0x8] sm:$0xff]  ;;  %v28_v4 = vld [vmem:[#allocation2 + $0x10] sm:$0xff]  ;;  %v29_v5 = vld [vmem:[#allocation2 + $0x18] sm:$0xff]  ;;  %v37_v10 = vlaneseq  ;;  %s1179_s24 = smov 32   ;;  %vm47_vm1 = vcmask 261120   ;;  %s1180_s25 = smov 96  }
  0x15   :  { %1090 = vset.pattern.permute.xlu0 %v1177_v2  ;;  %1037 = vmatprep.subr.bf16.mxu1 %v1174_v0  ;;  %v1215_v6 = vpack.c.bf16 %v28_v4, %v27_v3  ;;  %v30_v7 = vld [vmem:[#allocation2 + $0x20] sm:$0xff]  ;;  %vm872_vm2 = vcmask 261127   ;;  %s1181_s26 = smov [#allocation5]   ;;  %vm879_vm3 = vcmask 7175  }
  0x16   :  { %962 = vmatprep.mubr.msk.f32.mxu1 %vm1175_vm0, %v1176_v1  ;;  %v31_v8 = vld [vmem:[%s1332_s0] sm:$0xff]  ;;  %v1221_v9 = vpack.c.bf16 %v30_v7, %v29_v5  ;;  %v38_v11 = vshrl.u32 %v37_v10, 7  ;;  %s1178_s0 = smov 64   ;;  %s887_s27 = sshll.u32 %s1181_s26, 4  ;;  %s888_s27 = int_to_ptr.vmem [resolvable:$true] %s887_s27 }
  0x17   :  { %34 = vperm.xlu0 %1090, %v31_v8   ;;  %1033 = vmatpush3.bf16.msra.mxu0 %v1215_v6  ;;  %v1237_v13 = vld [vmem:[#allocation2] sm:$0xff]  ;;  %s1145_s28 = scalar_lea.vmem %s888_s27, 16  ;;  %s1149_s29 = scalar_lea.vmem %s888_s27, 32 }
  0x18   :  { %1039 = vmatpush3.bf16.msra.mxu1 %v1215_v6  ;;  %1034 = vmatprep.subr.bf16.mxu0 %v1174_v0  ;;  %v39_v12 = vsub.s32 0, %v38_v11  ;;  %v44_v14 = vsub.s32 1, %v38_v11  ;;  %p1146_p8 = scmp.ne.s32.totalorder %s888_s27, %s1145_s28  ;;  %p1150_p9 = scmp.lt.s32.totalorder %s888_s27, %s888_s27 }
  0x19   :  { %1040 = vmatprep.subr.bf16.mxu1 %v1174_v0  ;;  %p1151_p10 = scmp.lt.s32.totalorder %s1149_s29, %s1145_s28 }
  0x1a   :  { %v40_v15 = vrot.slane %v1237_v13, %v39_v12  ;;  %v45_v18 = vrot.slane %v1237_v13, %v44_v14 }
  0x1b   :  { %1036 = vmatpush3.bf16.msra.mxu0 %v1221_v9  ;;  %p1152_p11 = por %p1151_p10, %p1150_p9 }
  0x1c   :  { %1042 = vmatpush3.bf16.msra.mxu1 %v1221_v9  ;;  %1043 = vmatprep.subr.bf16.mxu0 %v1174_v0 }
  0x1d   :  { %1049 = vmatprep.subr.bf16.mxu1 %v1174_v0  ;;  %p1153_p12 = pnand %p1152_p11, %p1146_p8 }
  0x1e   :  { %952 = vmatmul.mubr.f32.vlgmr.msra.gmra.mrb[0].mxu0 %v1176_v1 }
  0x1f   :  { %1045 = vmatpush3.bf16.msra.mxu0 %v1215_v6  ;;  %973 = vmatprep.mubr.msk.f32.mxu0 %vm1175_vm0, %v1176_v1 }
  0x20   :  { %1046 = vmatprep.subr.bf16.mxu0 %v1174_v0 }
  0x23   :  { %1048 = vmatpush3.bf16.msra.mxu0 %v1221_v9 }
  0x24   :  { %1055 = vmatprep.subr.bf16.mxu0 %v1174_v0 }
  0x96   :  { %v35_v16 = vpop.permute.xlu0 %34 }
  0x97   :  { %v41_v17 = vmul.f32 %v40_v15, %v35_v16 }
  0x99   :  { %v1241_v19 = vadd.f32 %v45_v18, %v41_v17 }
  0xf1   :  { %v117_v20 = vpop.f32.mrb[0].mxu0 }
  0xf2   :  { %v121_v21 = vadd.f32 %v117_v20, %v1241_v19  ;;  %v953_v22 = vpop.f32.mrb[1].mxu0 }
  0xf4   :  { %1091 = vtanh.f32 %v121_v21 }
  0xfe   :  { %v1092_v23 = vpop.eup %1091 }
  0xff   :  { %127 = vrot.lane.b32.xlu0 %v1092_v23, %s1178_s0  ;;  %v123_v24 = vmul.f32 0.5, %v1092_v23 }
 0x101   :  { %v124_v25 = vadd.f32 0.5, %v123_v24 }
 0x103   :  { %v125_v28 = vmul.f32 0.0, %v124_v25 }
 0x171   :  { %v128_v26 = vpop.permute.xlu0 %127 }
 0x172   :  { %v130_v27 = vmul.f32 %v128_v26, %v124_v25 }
 0x174   :  { %132 = vrot.lane.b32.xlu1 %v130_v27, %s1179_s24 }
 0x1e6   :  { %v133_v29 = vpop.permute.xlu1 %132 }
 0x1e7   :  { %v135_v30 = vadd.f32 %v133_v29, %v125_v28 }
 0x1e9   :  { %1093 = vtanh.f32 %v135_v30  ;;  %v225_v44 = vrot.slane %v135_v30, 7 }
 0x1f3   :  { %v1094_v31 = vpop.eup %1093 }
 0x1f4   :  { %138 = vrot.lane.b32.xlu1 %v1094_v31, %s1178_s0 }
 0x266   :  { %v139_v32 = vpop.permute.xlu1 %138 }
 0x267   :  { %v141_v33 = vmul.f32 %v139_v32, %v124_v25 }
 0x269   :  { %143 = vrot.lane.b32.xlu0 %v141_v33, %s1179_s24 }
 0x2db   :  { %v144_v34 = vpop.permute.xlu0 %143 }
 0x2dc   :  { %963 = vmatmul.mubr.msk.f32.vlgmr.msra.gmra.mrb[0].mxu1 %vm47_vm1, %v144_v34 }
 0x2dd   :  { %1051 = vmatpush3.bf16.msra.mxu1 %v1215_v6  ;;  %984 = vmatprep.mubr.msk.f32.mxu1 %vm1175_vm0, %v1176_v1 }
 0x2de   :  { %1052 = vmatprep.subr.bf16.mxu1 %v1174_v0 }
 0x2e1   :  { %1054 = vmatpush3.bf16.msra.mxu1 %v1221_v9 }
 0x2e2   :  { %1061 = vmatprep.subr.bf16.mxu1 %v1174_v0 }
 0x3af   :  { %v213_v35 = vpop.f32.mrb[0].mxu1 }
 0x3b0   :  { %v218_v36 = vrot.slane %v213_v35, 7  ;;  %v964_v37 = vpop.f32.mrb[1].mxu1 }
 0x3b2   :  { %v220_v38 = vadd.f32 %v218_v36, %v1241_v19 }
 0x3b4   :  { %1095 = vtanh.f32 %v220_v38 }
 0x3be   :  { %v1096_v39 = vpop.eup %1095 }
 0x3bf   :  { %229 = vrot.lane.b32.xlu1 %v1096_v39, %s1178_s0  ;;  %v222_v40 = vmul.f32 0.5, %v1096_v39 }
 0x3c1   :  { %v223_v41 = vadd.f32 0.5, %v222_v40 }
 0x3c3   :  { %v227_v45 = vmul.f32 %v225_v44, %v223_v41 }
 0x431   :  { %v230_v42 = vpop.permute.xlu1 %229 }
 0x432   :  { %v232_v43 = vmul.f32 %v230_v42, %v223_v41 }
 0x434   :  { %234 = vrot.lane.b32.xlu0 %v232_v43, %s1179_s24 }
 0x4a6   :  { %v235_v46 = vpop.permute.xlu0 %234 }
 0x4a7   :  { %v237_v47 = vadd.f32 %v235_v46, %v227_v45 }
 0x4a9   :  { %1097 = vtanh.f32 %v237_v47  ;;  %v328_v62 = vrot.slane %v237_v47, 7 }
 0x4b3   :  { %v1098_v48 = vpop.eup %1097 }
 0x4b4   :  { %240 = vrot.lane.b32.xlu1 %v1098_v48, %s1178_s0 }
 0x526   :  { %v241_v49 = vpop.permute.xlu1 %240 }
 0x527   :  { %v243_v50 = vmul.f32 %v241_v49, %v223_v41 }
 0x529   :  { %v245_v51 = vrot.slane %v243_v50, 1 }
 0x52b   :  { %246 = vrot.lane.b32.xlu0 %v245_v51, %s1179_s24 }
 0x59d   :  { %v247_v52 = vpop.permute.xlu0 %246 }
 0x59e   :  { %974 = vmatmul.mubr.msk.f32.vlgmr.msra.gmra.mrb[2].mxu0 %vm47_vm1, %v247_v52 }
 0x59f   :  { %1057 = vmatpush3.bf16.msra.mxu0 %v1215_v6  ;;  %995 = vmatprep.mubr.msk.f32.mxu0 %vm1175_vm0, %v1176_v1 }
 0x5a0   :  { %1058 = vmatprep.subr.bf16.mxu0 %v1174_v0 }
 0x5a3   :  { %1060 = vmatpush3.bf16.msra.mxu0 %v1221_v9 }
 0x5a4   :  { %1067 = vmatprep.subr.bf16.mxu0 %v1174_v0 }
 0x671   :  { %v316_v53 = vpop.f32.mrb[2].mxu0 }
 0x672   :  { %v321_v54 = vrot.slane %v316_v53, 6  ;;  %v975_v55 = vpop.f32.mrb[3].mxu0 }
 0x674   :  { %v323_v56 = vadd.f32 %v321_v54, %v1241_v19 }
 0x676   :  { %1099 = vtanh.f32 %v323_v56 }
 0x680   :  { %v1100_v57 = vpop.eup %1099 }
 0x681   :  { %332 = vrot.lane.b32.xlu1 %v1100_v57, %s1178_s0  ;;  %v325_v58 = vmul.f32 0.5, %v1100_v57 }
 0x683   :  { %v326_v59 = vadd.f32 0.5, %v325_v58 }
 0x685   :  { %v330_v63 = vmul.f32 %v328_v62, %v326_v59 }
 0x6f3   :  { %v333_v60 = vpop.permute.xlu1 %332 }
 0x6f4   :  { %v335_v61 = vmul.f32 %v333_v60, %v326_v59 }
 0x6f6   :  { %337 = vrot.lane.b32.xlu0 %v335_v61, %s1179_s24 }
 0x768   :  { %v338_v2 = vpop.permute.xlu0 %337 }
 0x769   :  { %v340_v3 = vadd.f32 %v338_v2, %v330_v63 }
 0x76b   :  { %1101 = vtanh.f32 %v340_v3  ;;  %v431_v22 = vrot.slane %v340_v3, 7 }
 0x775   :  { %v1102_v4 = vpop.eup %1101 }
 0x776   :  { %343 = vrot.lane.b32.xlu1 %v1102_v4, %s1178_s0 }
 0x7e8   :  { %v344_v5 = vpop.permute.xlu1 %343 }
 0x7e9   :  { %v346_v7 = vmul.f32 %v344_v5, %v326_v59 }
 0x7eb   :  { %v348_v8 = vrot.slane %v346_v7, 2 }
 0x7ed   :  { %349 = vrot.lane.b32.xlu0 %v348_v8, %s1179_s24 }
 0x85f   :  { %v350_v10 = vpop.permute.xlu0 %349 }
 0x860   :  { %985 = vmatmul.mubr.msk.f32.vlgmr.msra.gmra.mrb[2].mxu1 %vm47_vm1, %v350_v10 }
 0x861   :  { %1063 = vmatpush3.bf16.msra.mxu1 %v1215_v6  ;;  %1006 = vmatprep.mubr.msk.f32.mxu1 %vm1175_vm0, %v1176_v1 }
 0x862   :  { %1064 = vmatprep.subr.bf16.mxu1 %v1174_v0 }
 0x865   :  { %1066 = vmatpush3.bf16.msra.mxu1 %v1221_v9 }
 0x866   :  { %1073 = vmatprep.subr.bf16.mxu1 %v1174_v0 }
 0x933   :  { %v419_v11 = vpop.f32.mrb[2].mxu1 }
 0x934   :  { %v424_v12 = vrot.slane %v419_v11, 5  ;;  %v986_v14 = vpop.f32.mrb[3].mxu1 }
 0x936   :  { %v426_v15 = vadd.f32 %v424_v12, %v1241_v19 }
 0x938   :  { %1103 = vtanh.f32 %v426_v15 }
 0x942   :  { %v1104_v16 = vpop.eup %1103 }
 0x943   :  { %435 = vrot.lane.b32.xlu1 %v1104_v16, %s1178_s0  ;;  %v428_v17 = vmul.f32 0.5, %v1104_v16 }
 0x945   :  { %v429_v18 = vadd.f32 0.5, %v428_v17 }
 0x947   :  { %v433_v23 = vmul.f32 %v431_v22, %v429_v18 }
 0x9b5   :  { %v436_v20 = vpop.permute.xlu1 %435 }
 0x9b6   :  { %v438_v21 = vmul.f32 %v436_v20, %v429_v18 }
 0x9b8   :  { %440 = vrot.lane.b32.xlu0 %v438_v21, %s1179_s24 }
 0xa2a   :  { %v441_v24 = vpop.permute.xlu0 %440 }
 0xa2b   :  { %v443_v25 = vadd.f32 %v441_v24, %v433_v23 }
 0xa2d   :  { %1105 = vtanh.f32 %v443_v25  ;;  %v534_v40 = vrot.slane %v443_v25, 7 }
 0xa37   :  { %v1106_v26 = vpop.eup %1105 }
 0xa38   :  { %446 = vrot.lane.b32.xlu1 %v1106_v26, %s1178_s0 }
 0xaaa   :  { %v447_v27 = vpop.permute.xlu1 %446 }
 0xaab   :  { %v449_v28 = vmul.f32 %v447_v27, %v429_v18 }
 0xaad   :  { %v451_v29 = vrot.slane %v449_v28, 3 }
 0xaaf   :  { %452 = vrot.lane.b32.xlu0 %v451_v29, %s1179_s24 }
 0xb21   :  { %v453_v30 = vpop.permute.xlu0 %452 }
 0xb22   :  { %996 = vmatmul.mubr.msk.f32.vlgmr.msra.gmra.mrb[4].mxu0 %vm47_vm1, %v453_v30 }
 0xb23   :  { %1069 = vmatpush3.bf16.msra.mxu0 %v1215_v6  ;;  %1017 = vmatprep.mubr.msk.f32.mxu0 %vm1175_vm0, %v1176_v1 }
 0xb24   :  { %1070 = vmatprep.subr.bf16.mxu0 %v1174_v0 }
 0xb27   :  { %1072 = vmatpush3.bf16.msra.mxu0 %v1221_v9 }
 0xbf5   :  { %v522_v31 = vpop.f32.mrb[4].mxu0 }
 0xbf6   :  { %v527_v32 = vrot.slane %v522_v31, 4  ;;  %v997_v33 = vpop.f32.mrb[5].mxu0 }
 0xbf8   :  { %v529_v34 = vadd.f32 %v527_v32, %v1241_v19  ;;  %v863_v32 = vrot.slane %v1237_v13, 4 }
 0xbfa   :  { %1107 = vtanh.f32 %v529_v34 }
 0xc04   :  { %v1108_v35 = vpop.eup %1107 }
 0xc05   :  { %538 = vrot.lane.b32.xlu1 %v1108_v35, %s1178_s0  ;;  %v531_v36 = vmul.f32 0.5, %v1108_v35 }
 0xc07   :  { %v532_v37 = vadd.f32 0.5, %v531_v36 }
 0xc09   :  { %v536_v41 = vmul.f32 %v534_v40, %v532_v37 }
 0xc77   :  { %v539_v38 = vpop.permute.xlu1 %538 }
 0xc78   :  { %v541_v39 = vmul.f32 %v539_v38, %v532_v37 }
 0xc7a   :  { %543 = vrot.lane.b32.xlu0 %v541_v39, %s1179_s24 }
 0xcec   :  { %v544_v42 = vpop.permute.xlu0 %543 }
 0xced   :  { %v546_v43 = vadd.f32 %v544_v42, %v536_v41 }
 0xcef   :  { %1109 = vtanh.f32 %v546_v43 }
 0xcf9   :  { %v1110_v44 = vpop.eup %1109 }
 0xcfa   :  { %549 = vrot.lane.b32.xlu1 %v1110_v44, %s1178_s0 }
 0xd6c   :  { %v550_v45 = vpop.permute.xlu1 %549 }
 0xd6d   :  { %v552_v46 = vmul.f32 %v550_v45, %v532_v37 }
 0xd6f   :  { %v554_v47 = vrot.slane %v552_v46, 4 }
 0xd71   :  { %555 = vrot.lane.b32.xlu0 %v554_v47, %s1179_s24 }
 0xde3   :  { %v556_v48 = vpop.permute.xlu0 %555 }
 0xde4   :  { %1007 = vmatmul.mubr.msk.f32.vlgmr.msra.gmra.mrb[4].mxu1 %vm47_vm1, %v556_v48 }
 0xde5   :  { %1075 = vmatpush3.bf16.msra.mxu1 %v1215_v6  ;;  %1028 = vmatprep.mubr.msk.f32.mxu1 %vm1175_vm0, %v1176_v1  ;;  %v637_v1 = vrot.slane %v546_v43, 7  ;;  %v876_v43 = vrot.slane %v1237_v13, 3 }
 0xde6   :  { %1076 = vmatprep.subr.bf16.mxu1 %v1174_v0 }
 0xde9   :  { %1078 = vmatpush3.bf16.msra.mxu1 %v1221_v9 }
 0xeb7   :  { %v625_v49 = vpop.f32.mrb[4].mxu1 }
 0xeb8   :  { %v630_v50 = vrot.slane %v625_v49, 3  ;;  %v1008_v51 = vpop.f32.mrb[5].mxu1 }
 0xeba   :  { %v632_v52 = vadd.f32 %v630_v50, %v1241_v19 }
 0xebc   :  { %1111 = vtanh.f32 %v632_v52 }
 0xec6   :  { %v1112_v53 = vpop.eup %1111 }
 0xec7   :  { %641 = vrot.lane.b32.xlu1 %v1112_v53, %s1178_s0  ;;  %v634_v54 = vmul.f32 0.5, %v1112_v53 }
 0xec9   :  { %v635_v55 = vadd.f32 0.5, %v634_v54 }
 0xecb   :  { %v639_v57 = vmul.f32 %v637_v1, %v635_v55 }
 0xf39   :  { %v642_v56 = vpop.permute.xlu1 %641 }
 0xf3a   :  { %v644_v6 = vmul.f32 %v642_v56, %v635_v55 }
 0xf3c   :  { %646 = vrot.lane.b32.xlu0 %v644_v6, %s1179_s24 }
 0xfae   :  { %v647_v0 = vpop.permute.xlu0 %646 }
 0xfaf   :  { %v649_v58 = vadd.f32 %v647_v0, %v639_v57 }
 0xfb1   :  { %1113 = vtanh.f32 %v649_v58  ;;  %v740_v12 = vrot.slane %v649_v58, 7 }
 0xfbb   :  { %v1114_v9 = vpop.eup %1113 }
 0xfbc   :  { %652 = vrot.lane.b32.xlu1 %v1114_v9, %s1178_s0 }
0x102e   :  { %v653_v59 = vpop.permute.xlu1 %652 }
0x102f   :  { %v655_v60 = vmul.f32 %v653_v59, %v635_v55 }
0x1031   :  { %v657_v61 = vrot.slane %v655_v60, 5 }
0x1033   :  { %658 = vrot.lane.b32.xlu0 %v657_v61, %s1179_s24 }
0x10a5   :  { %v659_v62 = vpop.permute.xlu0 %658 }
0x10a6   :  { %1018 = vmatmul.mubr.msk.f32.vlgmr.msra.gmra.mrb[6].mxu0 %vm47_vm1, %v659_v62 }
0x1179   :  { %v728_v63 = vpop.f32.mrb[6].mxu0 }
0x117a   :  { %v733_v2 = vrot.slane %v728_v63, 2  ;;  %v1019_v3 = vpop.f32.mrb[7].mxu0 }
0x117c   :  { %v735_v4 = vadd.f32 %v733_v2, %v1241_v19 }
0x117e   :  { %1115 = vtanh.f32 %v735_v4 }
0x1188   :  { %v1116_v5 = vpop.eup %1115 }
0x1189   :  { %744 = vrot.lane.b32.xlu1 %v1116_v5, %s1178_s0  ;;  %v737_v7 = vmul.f32 0.5, %v1116_v5 }
0x118b   :  { %v738_v8 = vadd.f32 0.5, %v737_v7 }
0x118d   :  { %v742_v14 = vmul.f32 %v740_v12, %v738_v8 }
0x11fb   :  { %v745_v10 = vpop.permute.xlu1 %744 }
0x11fc   :  { %v747_v11 = vmul.f32 %v745_v10, %v738_v8 }
0x11fe   :  { %749 = vrot.lane.b32.xlu0 %v747_v11, %s1179_s24 }
0x1270   :  { %v750_v15 = vpop.permute.xlu0 %749 }
0x1271   :  { %v752_v16 = vadd.f32 %v750_v15, %v742_v14 }
0x1273   :  { %1117 = vtanh.f32 %v752_v16  ;;  %v843_v33 = vrot.slane %v752_v16, 7 }
0x127d   :  { %v1118_v17 = vpop.eup %1117 }
0x127e   :  { %755 = vrot.lane.b32.xlu1 %v1118_v17, %s1178_s0 }
0x12f0   :  { %v756_v18 = vpop.permute.xlu1 %755 }
0x12f1   :  { %v758_v20 = vmul.f32 %v756_v18, %v738_v8 }
0x12f3   :  { %v760_v21 = vrot.slane %v758_v20, 6 }
0x12f5   :  { %761 = vrot.lane.b32.xlu0 %v760_v21, %s1179_s24 }
0x1367   :  { %v762_v22 = vpop.permute.xlu0 %761 }
0x1368   :  { %1029 = vmatmul.mubr.msk.f32.vlgmr.msra.gmra.mrb[6].mxu1 %vm47_vm1, %v762_v22 }
0x143b   :  { %v831_v23 = vpop.f32.mrb[6].mxu1 }
0x143c   :  { %v836_v24 = vrot.slane %v831_v23, 1  ;;  %v1030_v25 = vpop.f32.mrb[7].mxu1 }
0x143e   :  { %v838_v26 = vadd.f32 %v836_v24, %v1241_v19 }
0x1440   :  { %1119 = vtanh.f32 %v838_v26 }
0x144a   :  { %v1120_v27 = vpop.eup %1119 }
0x144b   :  { %847 = vrot.lane.b32.xlu1 %v1120_v27, %s1178_s0  ;;  %v840_v28 = vmul.f32 0.5, %v1120_v27 }
0x144d   :  { %v841_v29 = vadd.f32 0.5, %v840_v28 }
0x144f   :  { %v845_v34 = vmul.f32 %v843_v33, %v841_v29 }
0x14bd   :  { %v848_v30 = vpop.permute.xlu1 %847 }
0x14be   :  { %v850_v31 = vmul.f32 %v848_v30, %v841_v29 }
0x14c0   :  { %852 = vrot.lane.b32.xlu0 %v850_v31, %s1179_s24 }
0x14c4   :  { %864 = vrot.lane.b32.xlu0 %v863_v32, %s1180_s25 }
0x1532   :  { %v853_v35 = vpop.permute.xlu0 %852 }
0x1533   :  { %v855_v36 = vadd.f32 %v853_v35, %v845_v34 }
0x1535   :  { %1121 = vtanh.f32 %v855_v36 }
0x1536   :  { %v865_v38 = vpop.permute.xlu0 %864 }
0x153f   :  { %v1122_v19 = vpop.eup %1121 }
0x1540   :  { %858 = vrot.lane.b32.xlu1 %v1122_v19, %s1178_s0 }
0x15b2   :  { %v859_v37 = vpop.permute.xlu1 %858 }
0x15b3   :  { %v861_v39 = vmul.f32 %v859_v37, %v841_v29 }
0x15b5   :  { %v867_v40 = vmul.f32 %v865_v38, %v861_v39 }
0x15b7   :  { %869 = vrot.lane.b32.xlu1 %v867_v40, %s1179_s24 }
0x1629   :  { %v870_v41 = vpop.permute.xlu1 %869 }
0x162a   :  { %v873_v42 = vsel %vm872_vm2, %v870_v41, 0.0 }
0x162b   :  { %874 = vadd.xlane.f32.xlu0 %v873_v42 }
0x16b8   :  { %v875_v44 = vpop.xlane.xlu0 %874 }
0x16b9   :  { %v878_v45 = vadd.f32 %v876_v43, %v875_v44 }
0x16bb   :  { %880 = vst.msk [vmem:[#allocation5 - $0x7] sm:$0x80] %vm879_vm3, %v878_v45 }
0x16bc   :  { %1156 = shalt.err (!%p1153_p12)
}
0x16bd   :  { %s1157_s4 = scalar_lea.hbm %s1334_s2, 16 }
0x16be   :  { %p1158_p13 = scmp.ne.s32.totalorder %s1334_s2, %s1157_s4  ;;  %p1161_p0 = scmp.lt.u32.totalorder %s1157_s4, %s1334_s2 }
0x16c0   :  { %p1163_p1 = pnand %p1161_p0, %p1158_p13 }
0x16c2   :  { %1166 = shalt.err (!%p1163_p1)
}
0x16c3   :  { %890 = dma.vmem_to_hbm [thread:$0]  %s888_s27, 16, %s1334_s2, [#allocation4]  }
0x16c4   :  { %1169 = dma.done.wait [#allocation4], 16  }
0x16c5   :  { %1170 = vsyncadd [#allocation4], 4294967280 }
0x16c6   :  { %894 = vsyncpa [#allocation3], 1 }
0x16c7   :  { %895 = vsyncpa [#allocation4], 1 }

</bundles_post_ra>
